<compile_context>
chip_gen: v5e
topology: v5e:2x2
jax: 0.10.0
libtpu: 0.0.40
codegen_flags: <defaults>
</compile_context>

<pallas_src>
import numpy as np

import jax
import jax.numpy as jnp
from jax.experimental import pallas as pl
from jax.experimental.pallas import tpu as pltpu


def _round_up(n: int, m: int) -> int:
    return ((n + m - 1) // m) * m


def _pe_kernel(x_ref, emat_ref, phase_ref, o_ref):
    """One batch tile, output in the final reference layout.

    x_ref:     (tile_b, d_in)   input rows.
    emat_ref:  (d_in, d_out)    emat[c, j] = 2^(j // (2*d_in)) if j % d_in == c else 0.
    phase_ref: (1, d_out)       0 on sin columns, pi/2 on cos columns.
    o_ref:     (tile_b, d_out)  output tile (batch on sublanes, d_out on lanes).
    """
    x = x_ref[...].astype(jnp.float32)          # (T, d_in)
    emat = emat_ref[...]                        # (d_in, d_out) f32
    phase = phase_ref[...]                      # (1, d_out) f32
    d_in = x_ref.shape[1]

    # xw[b, j] = x[b, j % d_in] * 2^(j // (2*d_in)); static unrolled sum over the
    # (tiny) d_in axis keeps everything exact f32 on the VPU.
    xw = x[:, 0:1] * emat[0:1, :]
    for c in range(1, d_in):
        xw = xw + x[:, c:c + 1] * emat[c:c + 1, :]

    # cos(t) == sin(t + pi/2): one wide sin produces the reference-ordered row.
    o_ref[...] = jnp.sin(xw + phase).astype(o_ref.dtype)


def positional_encoder(x: jax.Array, n_freqs: int, *,
                       tile_b: int = 4096, out_dtype=None) -> jax.Array:
    """x: (batch, d_in) -> (batch, d_in * 2 * n_freqs) in the reference ordering."""
    B, d_in = x.shape
    d_out = d_in * 2 * n_freqs
    out_dtype = jnp.dtype(x.dtype if out_dtype is None else out_dtype)

    # Frequency-placement matrix and phase row (reference column ordering).
    j = np.arange(d_out)
    freq = (2.0 ** (j // (2 * d_in))).astype(np.float32)          # 2^p per output column
    coord = j % d_in                                              # which input coordinate
    is_cos = (j % (2 * d_in)) >= d_in
    emat = (freq[None, :]
            * (coord[None, :] == np.arange(d_in)[:, None])).astype(np.float32)
    phase = np.where(is_cos, np.float32(np.pi / 2.0),
                     np.float32(0.0)).astype(np.float32).reshape(1, d_out)

    # Tile selection: large tiles amortize per-step overhead; cap for v7x VMEM;
    # >= 2 grid steps once B >= 256 so both v7x TensorCores are used; sublane-align.
    tile_b = int(max(8, min(tile_b, 8192)))
    tile_b = _round_up(tile_b, 8)
    if B >= 256:
        tile_b = min(tile_b, _round_up(pl.cdiv(B, 2), 8))
    if tile_b >= B:
        tile_b = B                      # single full block (always a legal block shape)
    grid = (pl.cdiv(B, tile_b),)        # partial tail block handled by Pallas

    cost = pl.CostEstimate(
        flops=2 * B * d_in * d_out + 2 * B * d_out,
        transcendentals=B * d_out,
        bytes_accessed=B * d_in * x.dtype.itemsize + B * d_out * out_dtype.itemsize,
    )

    return pl.pallas_call(
        _pe_kernel,
        out_shape=jax.ShapeDtypeStruct((B, d_out), out_dtype),
        grid=grid,
        in_specs=[
            pl.BlockSpec((tile_b, d_in), lambda i: (i, 0)),
            pl.BlockSpec((d_in, d_out), lambda i: (0, 0)),
            pl.BlockSpec((1, d_out), lambda i: (0, 0)),
        ],
        out_specs=pl.BlockSpec((tile_b, d_out), lambda i: (i, 0)),
        compiler_params=pltpu.CompilerParams(
            dimension_semantics=("parallel",),
            vmem_limit_bytes=48 * 1024 * 1024,
        ),
        cost_estimate=cost,
    )(x, jnp.asarray(emat), jnp.asarray(phase))


def _reference(x: jax.Array, n_freqs: int) -> jax.Array:
    """Pure-JAX reference mirroring the PyTorch forward."""
    outs = []
    for p in range(n_freqs):
        f = float(2 ** p)
        outs.append(jnp.sin(x * f))
        outs.append(jnp.cos(x * f))
    return jnp.concatenate(outs, axis=-1)


if __name__ == "__main__":
    key = jax.random.PRNGKey(0)

    # Small shapes consistent with the module (d_in=3 coords, 6 frequencies -> d_out=36).
    batch, d_in, n_freqs = 16, 3, 6
    x = jax.random.normal(key, (batch, d_in), dtype=jnp.float32)
    out = jax.block_until_ready(positional_encoder(x, n_freqs))
    ref = _reference(x, n_freqs)
    assert out.shape == (batch, d_in * 2 * n_freqs), out.shape
    # cos is computed as sin(t + pi/2) and |x * 2^p| reaches ~100, so allow for
    # transcendental-approximation differences; real ordering/frequency bugs are O(1).
    assert jnp.allclose(out, ref, atol=1e-3, rtol=1e-3), "mismatch vs reference"

    # Second check: batch not a multiple of the tile -> multi-step grid + partial block.
    x2 = jax.random.normal(jax.random.PRNGKey(1), (300, d_in), dtype=jnp.float32)
    out2 = jax.block_until_ready(positional_encoder(x2, n_freqs, tile_b=128))
    ref2 = _reference(x2, n_freqs)
    assert out2.shape == (300, d_in * 2 * n_freqs), out2.shape
    assert jnp.allclose(out2, ref2, atol=1e-3, rtol=1e-3), "mismatch vs reference (tiled)"

    print("KERNEL_OK")
</pallas_src>

<mosaic_0001>
module attributes {stable_mosaic.version = 11 : i64} {
  func.func @_pe_kernel(%arg0: i32, %arg1: memref<16x3xf32, #tpu.memory_space<vmem>>, %arg2: memref<3x36xf32, #tpu.memory_space<vmem>>, %arg3: memref<1x36xf32, #tpu.memory_space<vmem>>, %arg4: memref<16x36xf32, #tpu.memory_space<vmem>>) attributes {dimension_semantics = [#tpu.dimension_semantics<parallel>], iteration_bounds = array<i64: 1>, scalar_prefetch = 0 : i64, scratch_operands = 0 : i64, tpu.core_type = #tpu.core_type<tc>, window_params = [{transform_indices = @transform_0, window_bounds = array<i64: 16, 3>}, {pipeline_mode = #tpu.pipeline_mode<synchronous>, transform_indices = @transform_1, window_bounds = array<i64: 3, 36>}, {pipeline_mode = #tpu.pipeline_mode<synchronous>, transform_indices = @transform_2, window_bounds = array<i64: 1, 36>}, {transform_indices = @transform_3, window_bounds = array<i64: 16, 36>}]} {
    %c0 = arith.constant 0 : index
    %c0_0 = arith.constant 0 : index
    %0 = vector.load %arg1[%c0, %c0_0] : memref<16x3xf32, #tpu.memory_space<vmem>>, vector<16x3xf32>
    %c0_1 = arith.constant 0 : index
    %c0_2 = arith.constant 0 : index
    %1 = vector.load %arg2[%c0_1, %c0_2] : memref<3x36xf32, #tpu.memory_space<vmem>>, vector<3x36xf32>
    %c0_3 = arith.constant 0 : index
    %c0_4 = arith.constant 0 : index
    %2 = vector.load %arg3[%c0_3, %c0_4] : memref<1x36xf32, #tpu.memory_space<vmem>>, vector<1x36xf32>
    %3 = vector.extract_strided_slice %0 {offsets = [0, 0], sizes = [16, 1], strides = [1, 1]} : vector<16x3xf32> to vector<16x1xf32>
    %4 = vector.extract_strided_slice %1 {offsets = [0, 0], sizes = [1, 36], strides = [1, 1]} : vector<3x36xf32> to vector<1x36xf32>
    %5 = vector.broadcast %3 : vector<16x1xf32> to vector<16x36xf32>
    %6 = vector.broadcast %4 : vector<1x36xf32> to vector<16x36xf32>
    %7 = arith.mulf %5, %6 : vector<16x36xf32>
    %8 = vector.extract_strided_slice %0 {offsets = [0, 1], sizes = [16, 1], strides = [1, 1]} : vector<16x3xf32> to vector<16x1xf32>
    %9 = vector.extract_strided_slice %1 {offsets = [1, 0], sizes = [1, 36], strides = [1, 1]} : vector<3x36xf32> to vector<1x36xf32>
    %10 = vector.broadcast %8 : vector<16x1xf32> to vector<16x36xf32>
    %11 = vector.broadcast %9 : vector<1x36xf32> to vector<16x36xf32>
    %12 = arith.mulf %10, %11 : vector<16x36xf32>
    %13 = arith.addf %7, %12 : vector<16x36xf32>
    %14 = vector.extract_strided_slice %0 {offsets = [0, 2], sizes = [16, 1], strides = [1, 1]} : vector<16x3xf32> to vector<16x1xf32>
    %15 = vector.extract_strided_slice %1 {offsets = [2, 0], sizes = [1, 36], strides = [1, 1]} : vector<3x36xf32> to vector<1x36xf32>
    %16 = vector.broadcast %14 : vector<16x1xf32> to vector<16x36xf32>
    %17 = vector.broadcast %15 : vector<1x36xf32> to vector<16x36xf32>
    %18 = arith.mulf %16, %17 : vector<16x36xf32>
    %19 = arith.addf %13, %18 : vector<16x36xf32>
    %20 = vector.broadcast %2 : vector<1x36xf32> to vector<16x36xf32>
    %21 = arith.addf %19, %20 : vector<16x36xf32>
    %22 = math.sin %21 : vector<16x36xf32>
    %c0_5 = arith.constant 0 : index
    %c0_6 = arith.constant 0 : index
    %23 = vector.load %arg4[%c0_5, %c0_6] : memref<16x36xf32, #tpu.memory_space<vmem>>, vector<16x36xf32>
    tpu.vector_store %arg4[%c0_5, %c0_6], %22 {strides = array<i32>} : memref<16x36xf32, #tpu.memory_space<vmem>>, vector<16x36xf32>,
    return
  }
  func.func @transform_0(%arg0: i32) -> (i32, i32) {
    %c0_i32 = arith.constant 0 : i32
    %c0_i32_0 = arith.constant 0 : i32
    return %arg0, %c0_i32 : i32, i32
  }
  func.func @transform_1(%arg0: i32) -> (i32, i32) {
    %c0_i32 = arith.constant 0 : i32
    %c0_i32_0 = arith.constant 0 : i32
    %c0_i32_1 = arith.constant 0 : i32
    return %c0_i32, %c0_i32_0 : i32, i32
  }
  func.func @transform_2(%arg0: i32) -> (i32, i32) {
    %c0_i32 = arith.constant 0 : i32
    %c0_i32_0 = arith.constant 0 : i32
    %c0_i32_1 = arith.constant 0 : i32
    return %c0_i32, %c0_i32_0 : i32, i32
  }
  func.func @transform_3(%arg0: i32) -> (i32, i32) {
    %c0_i32 = arith.constant 0 : i32
    %c0_i32_0 = arith.constant 0 : i32
    return %arg0, %c0_i32 : i32, i32
  }
}

</mosaic_0001>

<bundles_post_ra>
// kernel: tpu_custom_call.1
= control target key start
LH: loop header
LB: loop body
LE: loop exit
PB: predicated region body
PF: predicated region fallthrough
CT: control target
= control target key end

     0   :  { %v443_v1 = vmov 1   ;;  %v444_v2 = vmov 0   ;;  %s645_s0 = inlined_call_operand.vmem [shape: f32[16,3], index: 0, kind: input, shape index: {}]   ;;  %s646_s1 = inlined_call_operand.vmem [shape: f32[3,36], index: 1, kind: input, shape index: {}]   ;;  %s647_s2 = inlined_call_operand.vmem [shape: f32[1,36], index: 2, kind: input, shape index: {}]   ;;  %s648_s3 = inlined_call_operand.hbm [shape: f32[16,36], index: 3, kind: output, shape index: {}]  }
   0x1   :  { %v15_v0 = vld [vmem:[%s645_s0] sm:$0xff]  ;;  %413 = vset.pattern.permute.xlu1 %v443_v1  ;;  %412 = vset.pattern.permute.xlu0 %v444_v2 }
   0x2   :  { %8 = vsyncpa [#allocation3], 0  ;;  %33 = vperm.xlu1 %413, %v15_v0   ;;  %21 = vperm.xlu0 %412, %v15_v0   ;;  %v445_v3 = vmov 2   ;;  %v16_v4 = vld [vmem:[%s645_s0 + $0x8] sm:$0xff]  ;;  %v17_v5 = vld [vmem:[%s646_s1] sm:$0x7] }
   0x3   :  { %414 = vset.pattern.permute.xlu2 %v445_v3  ;;  %v53_v6 = vperm.slane %v17_v5, 2  ;;  %v40_v7 = vperm.slane %v17_v5, 1  ;;  %v29_v8 = vperm.slane %v17_v5, 0  ;;  %v416_v15 = vld [vmem:[%s647_s2] ss:$0 sm:$0xff]  ;;  %s452_s0 = smov [#allocation2]  }
   0x4   :  { %46 = vperm.xlu2 %414, %v15_v0   ;;  %v446_v45 = vmov 683565275   ;;  %v447_v47 = vmov 2475754826   ;;  %v448_v49 = vmov 2131351028  }
   0x5   :  { %v449_v51 = vmov 2102212464   ;;  %v450_v56 = vmov 920167782   ;;  %v451_v59 = vmov 1326507024  }
   0x6   :  { %s380_s1 = sshll.u32 %s452_s0, 4  ;;  %s382_s21 = sshll.u32 %s648_s3, 4  ;;  %s381_s1 = int_to_ptr.vmem [resolvable:$true] %s380_s1  ;;  %s383_s21 = int_to_ptr.hbm [resolvable:$true] %s382_s21 }
   0x7   :  { %s453_s22 = smov 128   ;;  %s454_s23 = smov 8  }
   0xa   :  { %37 = vperm.xlu1 %413, %v16_v4   ;;  %26 = vperm.xlu0 %412, %v16_v4  }
   0xc   :  { %50 = vperm.xlu2 %414, %v16_v4  }
  0x12   :  { %415 = vset.pattern.permute.xlu0 %v445_v3 }
  0x5e   :  { %v47_v9 = vpop.permute.xlu2 %46 }
  0x5f   :  { %v54_v12 = vmul.f32 %v53_v6, %v47_v9 }
  0x66   :  { %v51_v23 = vpop.permute.xlu2 %50 }
  0x67   :  { %v55_v28 = vmul.f32 %v53_v6, %v51_v23 }
  0x74   :  { %v34_v10 = vpop.permute.xlu1 %33  ;;  %v22_v11 = vpop.permute.xlu0 %21 }
  0x75   :  { %v41_v13 = vmul.f32 %v40_v7, %v34_v10  ;;  %v30_v14 = vmul.f32 %v29_v8, %v22_v11 }
  0x77   :  { %v43_v16 = vadd.f32 %v41_v13, %v30_v14 }
  0x79   :  { %v56_v17 = vadd.f32 %v54_v12, %v43_v16 }
  0x7b   :  { %v488_v18 = vadd.f32 %v416_v15, %v56_v17 }
  0x7c   :  { %v38_v19 = vpop.permute.xlu1 %37  ;;  %v27_v20 = vpop.permute.xlu0 %26 }
  0x7d   :  { %v63_v21 = vand.u32 2147483647, %v488_v18  ;;  %v66_v22 = vand.u32 2139095040, %v488_v18  ;;  %v42_v24 = vmul.f32 %v40_v7, %v38_v19  ;;  %v31_v25 = vmul.f32 %v29_v8, %v27_v20 }
  0x7f   :  { %v67_v26 = vshrl.u32 %v66_v22, 23  ;;  %v70_v27 = vand.u32 8388607, %v63_v21  ;;  %v44_v29 = vadd.f32 %v42_v24, %v31_v25 }
  0x81   :  { %v394_v30 = vadd.s32 4294967169, %v67_v26  ;;  %v71_v31 = vor.u32 8388608, %v70_v27  ;;  %v57_v32 = vadd.f32 %v55_v28, %v44_v29 }
  0x83   :  { %v73_v33 = vadd.s32 1, %v394_v30  ;;  %v494_v34 = vadd.f32 %v416_v15, %v57_v32  ;;  %v496_v35 = vshll.u32 %v71_v31, 8 }
  0x85   :  { %vm74_vm0 = vcmp.gt.s32.totalorder %v73_v33, 0  ;;  %v218_v37 = vand.u32 2147483647, %v494_v34  ;;  %v221_v38 = vand.u32 2139095040, %v494_v34  ;;  %v112_v42 = vand.u32 65535, %v496_v35 }
  0x86   :  { %v75_v36 = vsel %vm74_vm0, %v73_v33, 0  ;;  %v113_v19 = vshrl.u32 %v496_v35, 16 }
  0x87   :  { %v77_v39 = vand.u32 31, %v75_v36  ;;  %v76_v40 = vshrl.u32 %v75_v36, 5  ;;  %v222_v43 = vshrl.u32 %v221_v38, 23  ;;  %v225_v44 = vand.u32 8388607, %v218_v37 }
  0x89   :  { %v78_v41 = vsub.s32 32, %v77_v39  ;;  %v80_v46 = vshll.u32 %v446_v45, %v77_v39  ;;  %v83_v48 = vshll.u32 %v447_v47, %v77_v39  ;;  %v86_v50 = vshll.u32 %v448_v49, %v77_v39 }
  0x8a   :  { %v89_v52 = vshll.u32 %v449_v51, %v77_v39  ;;  %v92_v57 = vshll.u32 %v450_v56, %v77_v39  ;;  %vm95_vm1 = vcmp.lt.s32.totalorder %v76_v40, 1  ;;  %vm96_vm2 = vcmp.lt.s32.totalorder %v76_v40, 2 }
  0x8b   :  { %v81_v53 = vshrl.u32 %v447_v47, %v78_v41  ;;  %v84_v54 = vshrl.u32 %v448_v49, %v78_v41  ;;  %v87_v55 = vshrl.u32 %v449_v51, %v78_v41  ;;  %v90_v58 = vshrl.u32 %v450_v56, %v78_v41 }
  0x8c   :  { %v93_v60 = vshrl.u32 %v451_v59, %v78_v41  ;;  %v397_v0 = vadd.s32 4294967169, %v222_v43  ;;  %v79_v1 = vshrl.u32 %v446_v45, %v78_v41  ;;  %vm98_vm3 = vcmp.lt.s32.totalorder %v76_v40, 4 }
  0x8d   :  { %v82_v61 = vor.u32 %v81_v53, %v80_v46  ;;  %v85_v62 = vor.u32 %v84_v54, %v83_v48  ;;  %v88_v63 = vor.u32 %v87_v55, %v86_v50  ;;  %v91_v3 = vor.u32 %v90_v58, %v89_v52 }
  0x8e   :  { %v94_v4 = vor.u32 %v93_v60, %v92_v57  ;;  %vm97_vm4 = vcmp.lt.s32.totalorder %v76_v40, 3  ;;  %v226_v10 = vor.u32 8388608, %v225_v44  ;;  %v228_v11 = vadd.s32 1, %v397_v0 }
  0x8f   :  { %v100_v5 = vsel %vm98_vm3, %v88_v63, 2102212464  ;;  %v103_v6 = vsel %vm95_vm1, %v82_v61, %v85_v62  ;;  %v107_v7 = vsel %vm95_vm1, %v85_v62, %v88_v63  ;;  %v104_v8 = vsel %vm98_vm3, %v91_v3, 920167782 }
  0x90   :  { %v108_v9 = vsel %vm98_vm3, %v94_v4, 1326507024  ;;  %v99_v12 = vsel %vm95_vm1, %v79_v1, %v82_v61  ;;  %v101_v13 = vsel %vm97_vm4, %v85_v62, %v100_v5  ;;  %v105_v14 = vsel %vm97_vm4, %v88_v63, %v104_v8 }
  0x91   :  { %v109_v15 = vsel %vm97_vm4, %v91_v3, %v108_v9  ;;  %v106_v16 = vsel %vm96_vm2, %v103_v6, %v105_v14  ;;  %vm229_vm5 = vcmp.gt.s32.totalorder %v228_v11, 0  ;;  %v521_v25 = vsel %vm96_vm2, %v99_v12, %v101_v13 }
  0x92   :  { %v110_v17 = vsel %vm96_vm2, %v107_v7, %v109_v15  ;;  %v136_v23 = vand.u32 65535, %v106_v16  ;;  %v137_v24 = vshrl.u32 %v106_v16, 16  ;;  %v230_v28 = vsel %vm229_vm5, %v228_v11, 0 }
  0x93   :  { %v114_v20 = vand.u32 65535, %v110_v17  ;;  %v115_v22 = vshrl.u32 %v110_v17, 16  ;;  %v523_v29 = vshll.u32 %v226_v10, 8  ;;  %v232_v52 = vand.u32 31, %v230_v28 }
  0x94   :  { %v139_v32 = vmul.u32 %v137_v24, %v112_v42  ;;  %v140_v33 = vmul.u32 %v136_v23, %v113_v19  ;;  %v138_v39 = vmul.u32 %v136_v23, %v112_v42  ;;  %v141_v41 = vmul.u32 %v137_v24, %v113_v19 }
  0x95   :  { %v117_v26 = vmul.u32 %v115_v22, %v112_v42  ;;  %v118_v27 = vmul.u32 %v114_v20, %v113_v19  ;;  %v116_v30 = vmul.u32 %v114_v20, %v112_v42  ;;  %v119_v31 = vmul.u32 %v115_v22, %v113_v19 }
  0x96   :  { %v142_v46 = vshll.u32 %v139_v32, 16  ;;  %v143_v48 = vshrl.u32 %v139_v32, 16  ;;  %v144_v50 = vshll.u32 %v140_v33, 16  ;;  %v145_v54 = vshrl.u32 %v140_v33, 16 }
  0x97   :  { %v120_v36 = vshll.u32 %v117_v26, 16  ;;  %v121_v38 = vshrl.u32 %v117_v26, 16  ;;  %v122_v43 = vshll.u32 %v118_v27, 16  ;;  %v123_v44 = vshrl.u32 %v118_v27, 16 }
  0x98   :  { %vm146_vm7 = vc.u32 %v138_v39, %v142_v46  ;;  %v148_v55 = vadd.s32 %v142_v46, %v138_v39  ;;  %v527_v60 = vsub.s32 32, %v232_v52  ;;  %v530_v62 = vshrl.u32 %v230_v28, 5 }
  0x99   :  { %vm124_vm6 = vc.u32 %v116_v30, %v120_v36  ;;  %v126_v40 = vadd.s32 %v120_v36, %v116_v30  ;;  %v147_v58 = vsel %vm146_vm7, 1, %v444_v2  ;;  %v235_v3 = vshll.u32 %v446_v45, %v232_v52 }
  0x9a   :  { %v125_v53 = vsel %vm124_vm6, 1, %v444_v2  ;;  %v149_v61 = vadd.s32 %v147_v58, %v141_v41  ;;  %vm150_vm9 = vc.u32 %v148_v55, %v144_v50  ;;  %v533_v1 = vadd.s32 %v148_v55, %v144_v50 }
  0x9b   :  { %v127_v57 = vadd.s32 %v125_v53, %v119_v31  ;;  %vm128_vm8 = vc.u32 %v126_v40, %v122_v43  ;;  %v151_v0 = vsel %vm150_vm9, 1, %v444_v2  ;;  %v236_v5 = vshrl.u32 %v447_v47, %v527_v60 }
  0x9c   :  { %v129_v42 = vsel %vm128_vm8, 1, %v444_v2  ;;  %v153_v4 = vadd.s32 %v151_v0, %v149_v61  ;;  %v238_v6 = vshll.u32 %v447_v47, %v232_v52  ;;  %v239_v7 = vshrl.u32 %v448_v49, %v527_v60 }
  0x9d   :  { %v131_v63 = vadd.s32 %v129_v42, %v127_v57  ;;  %v241_v9 = vshll.u32 %v448_v49, %v232_v52  ;;  %v242_v10 = vshrl.u32 %v449_v51, %v527_v60  ;;  %v244_v11 = vshll.u32 %v449_v51, %v232_v52 }
  0x9e   :  { %v154_v12 = vadd.s32 %v153_v4, %v143_v48  ;;  %v545_v13 = vor.u32 %v236_v5, %v235_v3  ;;  %v547_v14 = vor.u32 %v239_v7, %v238_v6  ;;  %v245_v15 = vshrl.u32 %v450_v56, %v527_v60 }
  0x9f   :  { %v132_v8 = vadd.s32 %v131_v63, %v121_v38  ;;  %v243_v16 = vor.u32 %v242_v10, %v241_v9  ;;  %v247_v17 = vshll.u32 %v450_v56, %v232_v52  ;;  %v248_v49 = vshrl.u32 %v451_v59, %v527_v60 }
  0xa0   :  { %v155_v19 = vadd.s32 %v154_v12, %v145_v54  ;;  %v246_v20 = vor.u32 %v245_v15, %v244_v11  ;;  %v156_v51 = vmul.u32 %v496_v35, %v521_v25  ;;  %vm250_vm11 = vcmp.lt.s32.totalorder %v530_v62, 1 }
  0xa1   :  { %v551_v47 = vadd.s32 %v132_v8, %v123_v44  ;;  %v249_v22 = vor.u32 %v248_v49, %v247_v17  ;;  %vm253_vm12 = vcmp.lt.s32.totalorder %v530_v62, 4  ;;  %v258_v56 = vsel %vm250_vm11, %v545_v13, %v547_v14 }
  0xa2   :  { %v159_v23 = vadd.s32 1, %v155_v19  ;;  %v267_v59 = vand.u32 65535, %v523_v29  ;;  %vm252_vm13 = vcmp.lt.s32.totalorder %v530_v62, 3  ;;  %v259_v35 = vsel %vm253_vm12, %v246_v20, 920167782 }
  0xa3   :  { %vm158_vm10 = vc.u32 %v551_v47, %v533_v1  ;;  %v262_v24 = vsel %vm250_vm11, %v547_v14, %v243_v16  ;;  %v263_v25 = vsel %vm253_vm12, %v249_v22, 1326507024  ;;  %vm251_vm14 = vcmp.lt.s32.totalorder %v530_v62, 2 }
  0xa4   :  { %v160_v26 = vsel %vm158_vm10, %v159_v23, %v155_v19  ;;  %v260_v27 = vsel %vm252_vm13, %v243_v16, %v259_v35  ;;  %v264_v28 = vsel %vm252_vm13, %v246_v20, %v263_v25  ;;  %v268_v33 = vshrl.u32 %v523_v29, 16 }
  0xa5   :  { %v161_v30 = vadd.s32 %v160_v26, %v156_v51  ;;  %v261_v31 = vsel %vm251_vm14, %v258_v56, %v260_v27  ;;  %v265_v32 = vsel %vm251_vm14, %v262_v24, %v264_v28  ;;  %v255_v55 = vsel %vm253_vm12, %v243_v16, 2102212464 }
  0xa6   :  { %v269_v36 = vand.u32 65535, %v265_v32  ;;  %v270_v38 = vshrl.u32 %v265_v32, 16  ;;  %v291_v39 = vand.u32 65535, %v261_v31  ;;  %v292_v41 = vshrl.u32 %v261_v31, 16 }
  0xa7   :  { %v162_v43 = vadd.s32 536870912, %v161_v30  ;;  %v234_v17 = vshrl.u32 %v446_v45, %v527_v60  ;;  %v157_v28 = vadd.s32 %v533_v1, %v551_v47  ;;  %vm65_vm6 = vcmp.lt.s32.totalorder %v488_v18, 0 }
  0xa8   :  { %v272_v44 = vmul.u32 %v270_v38, %v267_v59  ;;  %v273_v46 = vmul.u32 %v269_v36, %v268_v33  ;;  %v294_v40 = vmul.u32 %v292_v41, %v267_v59  ;;  %v295_v50 = vmul.u32 %v291_v39, %v268_v33 }
  0xa9   :  { %v585_v48 = vshrl.u32 %v162_v43, 30  ;;  %v271_v52 = vmul.u32 %v269_v36, %v267_v59  ;;  %v274_v57 = vmul.u32 %v270_v38, %v268_v33  ;;  %v293_v63 = vmul.u32 %v291_v39, %v267_v59 }
  0xaa   :  { %v275_v53 = vshll.u32 %v272_v44, 16  ;;  %v297_v58 = vshll.u32 %v294_v40, 16  ;;  %v277_v42 = vshll.u32 %v273_v46, 16  ;;  %v296_v4 = vmul.u32 %v292_v41, %v268_v33 }
  0xab   :  { %v164_v54 = vshll.u32 %v585_v48, 30  ;;  %v299_v5 = vshll.u32 %v295_v50, 16  ;;  %v276_v11 = vshrl.u32 %v272_v44, 16  ;;  %v278_v49 = vshrl.u32 %v273_v46, 16 }
  0xac   :  { %vm279_vm15 = vc.u32 %v271_v52, %v275_v53  ;;  %v281_v61 = vadd.s32 %v275_v53, %v271_v52  ;;  %vm301_vm1 = vc.u32 %v293_v63, %v297_v58  ;;  %v303_v7 = vadd.s32 %v297_v58, %v293_v63 }
  0xad   :  { %v165_v0 = vsub.s32 %v161_v30, %v164_v54  ;;  %v280_v3 = vsel %vm279_vm15, 1, %v444_v2  ;;  %v302_v10 = vsel %vm301_vm1, 1, %v444_v2  ;;  %v298_v22 = vshrl.u32 %v294_v40, 16 }
  0xae   :  { %v282_v6 = vadd.s32 %v280_v3, %v274_v57  ;;  %vm283_vm0 = vc.u32 %v281_v61, %v277_v42  ;;  %v304_v15 = vadd.s32 %v302_v10, %v296_v4  ;;  %vm305_vm3 = vc.u32 %v303_v7, %v299_v5 }
  0xaf   :  { %vm166_vm2 = vcmp.lt.s32.totalorder %v165_v0, 0  ;;  %v167_v8 = vsub.s32 0, %v165_v0  ;;  %v284_v9 = vsel %vm283_vm0, 1, %v444_v2  ;;  %v306_v19 = vsel %vm305_vm3, 1, %v444_v2 }
  0xb0   :  { %v286_v12 = vadd.s32 %v284_v9, %v282_v6  ;;  %v308_v23 = vadd.s32 %v306_v19, %v304_v15  ;;  %v254_v56 = vsel %vm250_vm11, %v234_v17, %v545_v13  ;;  %v256_v59 = vsel %vm252_vm13, %v547_v14, %v255_v55 }
  0xb1   :  { %v168_v16 = vsel %vm166_vm2, %v167_v8, %v165_v0  ;;  %v300_v25 = vshrl.u32 %v295_v50, 16  ;;  %v307_v45 = vadd.s32 %v303_v7, %v299_v5  ;;  %v257_v2 = vsel %vm251_vm14, %v254_v56, %v256_v59 }
  0xb2   :  { %v169_v20 = vclz %v168_v16  ;;  %v287_v51 = vadd.s32 %v286_v12, %v276_v11  ;;  %v309_v26 = vadd.s32 %v308_v23, %v298_v22  ;;  %v311_v14 = vmul.u32 %v523_v29, %v257_v2 }
  0xb3   :  { %vm613_vm8 = vcmp.le.f32.partialorder %v63_v21, 0.7853982  ;;  %v187_v57 = vsub.s32 4, %v585_v48  ;;  %vm373_vm13 = vcmask 293888   ;;  %vm220_vm14 = vcmp.lt.s32.totalorder %v494_v34, 0 }
  0xb4   :  { %v395_v35 = vadd.s32 4294967294, %v169_v20  ;;  %v288_v24 = vadd.s32 %v287_v51, %v278_v49  ;;  %v310_v60 = vadd.s32 %v309_v26, %v300_v25  ;;  %vm206_vm15 = vweird.f32 %v488_v18 }
  0xb5   :  { %vm628_vm0 = vcmp.le.f32.partialorder %v218_v37, 0.7853982 }
  0xb6   :  { %vm396_vm4 = vcmp.lt.s32.totalorder %v395_v35, 0  ;;  %vm313_vm5 = vc.u32 %v288_v24, %v307_v45  ;;  %v314_v31 = vadd.s32 1, %v310_v60  ;;  %v312_v10 = vadd.s32 %v307_v45, %v288_v24 }
  0xb7   :  { %v172_v27 = vsel %vm396_vm4, 0, %v395_v35  ;;  %vm361_vm4 = vweird.f32 %v494_v34 }
  0xb8   :  { %v173_v13 = vsub.s32 32, %v172_v27  ;;  %v177_v30 = vsub.s32 4294967266, %v172_v27  ;;  %v174_v32 = vshll.u32 %v165_v0, %v172_v27  ;;  %v315_v38 = vsel %vm313_vm5, %v314_v31, %v310_v60 }
  0xb9   :  { %v316_v39 = vadd.s32 %v315_v38, %v311_v14  ;;  %v188_v0 = vsel %vm65_vm6, %v187_v57, %v585_v48 }
  0xba   :  { %v175_v33 = vshrl.u32 %v157_v28, %v173_v13  ;;  %v178_v36 = vadd.s32 127, %v177_v30  ;;  %v190_v8 = vsel %vm613_vm8, 0, %v188_v0 }
  0xbb   :  { %v317_v62 = vadd.s32 536870912, %v316_v39  ;;  %v207_v20 = vadd.s32 3, %v190_v8 }
  0xbc   :  { %v176_v41 = vor.u32 %v175_v33, %v174_v32  ;;  %v179_v43 = vshll.u32 %v178_v36, 23 }
  0xbd   :  { %v607_v46 = vshrl.u32 %v317_v62, 30  ;;  %v208_v26 = vand.u32 3, %v207_v20 }
  0xbe   :  { %v180_v44 = vor.u32 4788187, %v179_v43  ;;  %v183_v50 = vcvt.s32.f32 %v176_v41 }
  0xbf   :  { %v319_v1 = vshll.u32 %v607_v46, 30  ;;  %vm209_vm10 = vcmp.lt.s32.totalorder %v208_v26, 2  ;;  %vm210_vm11 = vcmp.eq.s32.totalorder %v208_v26, 0  ;;  %vm213_vm12 = vcmp.eq.s32.totalorder %v208_v26, 2 }
  0xc0   :  { %v181_v40 = vand.u32 2147483647, %v180_v44  ;;  %v342_v38 = vsub.s32 4, %v607_v46 }
  0xc1   :  { %v320_v52 = vsub.s32 %v316_v39, %v319_v1 }
  0xc2   :  { %v184_v47 = vmul.f32 %v183_v50, %v181_v40  ;;  %v343_v62 = vsel %vm220_vm14, %v342_v38, %v607_v46 }
  0xc3   :  { %vm321_vm7 = vcmp.lt.s32.totalorder %v320_v52, 0  ;;  %v322_v29 = vsub.s32 0, %v320_v52  ;;  %v345_v50 = vsel %vm628_vm0, 0, %v343_v62 }
  0xc4   :  { %v185_v53 = vxor.u32 2147483648, %v184_v47 }
  0xc5   :  { %v323_v42 = vsel %vm321_vm7, %v322_v29, %v320_v52 }
  0xc6   :  { %v186_v55 = vsel %vm65_vm6, %v185_v53, %v184_v47  ;;  %v324_v63 = vclz %v323_v42  ;;  %v362_v53 = vadd.s32 3, %v345_v50 }
  0xc7   :  { %v189_v58 = vsel %vm613_vm8, %v488_v18, %v186_v55 }
  0xc8   :  { %v191_v61 = vmul.f32 %v189_v58, %v189_v58  ;;  %v398_v4 = vadd.s32 4294967294, %v324_v63 }
  0xca   :  { %v199_v3 = vmul.f32 -0.00019511016, %v191_v61  ;;  %v192_v5 = vmul.f32 -0.001358992, %v191_v61  ;;  %vm399_vm9 = vcmp.lt.s32.totalorder %v398_v4, 0 }
  0xcb   :  { %v327_v7 = vsel %vm399_vm9, 0, %v398_v4 }
  0xcc   :  { %v200_v6 = vadd.f32 0.008332121, %v199_v3  ;;  %v193_v21 = vadd.f32 0.041655596, %v192_v5  ;;  %v328_v11 = vsub.s32 32, %v327_v7  ;;  %v332_v12 = vsub.s32 4294967266, %v327_v7 }
  0xcd   :  { %v329_v17 = vshll.u32 %v320_v52, %v327_v7 }
  0xce   :  { %v201_v9 = vmul.f32 %v200_v6, %v191_v61  ;;  %v194_v15 = vmul.f32 %v193_v21, %v191_v61  ;;  %v330_v49 = vshrl.u32 %v312_v10, %v328_v11  ;;  %v333_v19 = vadd.s32 127, %v332_v12 }
  0xd0   :  { %v202_v16 = vadd.f32 -0.16666654, %v201_v9  ;;  %v195_v48 = vadd.f32 -0.4999988, %v194_v15  ;;  %v331_v22 = vor.u32 %v330_v49, %v329_v17  ;;  %v334_v23 = vshll.u32 %v333_v19, 23 }
  0xd2   :  { %v203_v51 = vmul.f32 %v202_v16, %v191_v61  ;;  %v196_v56 = vmul.f32 %v195_v48, %v191_v61  ;;  %v335_v35 = vor.u32 4788187, %v334_v23  ;;  %v338_v24 = vcvt.s32.f32 %v331_v22 }
  0xd4   :  { %v204_v59 = vadd.f32 1.0, %v203_v51  ;;  %v197_v25 = vadd.f32 1.0, %v196_v56  ;;  %v336_v60 = vand.u32 2147483647, %v335_v35 }
  0xd6   :  { %v205_v2 = vmul.f32 %v204_v59, %v189_v58  ;;  %v214_v45 = vxor.u32 2147483648, %v197_v25  ;;  %v339_v27 = vmul.f32 %v338_v24, %v336_v60  ;;  %v363_v58 = vand.u32 3, %v362_v53 }
  0xd8   :  { %v211_v28 = vxor.u32 2147483648, %v205_v2  ;;  %v340_v13 = vxor.u32 2147483648, %v339_v27  ;;  %v215_v31 = vsel %vm213_vm12, %v214_v45, %v205_v2  ;;  %vm365_vm1 = vcmp.eq.s32.totalorder %v363_v58, 0 }
  0xd9   :  { %vm368_vm2 = vcmp.eq.s32.totalorder %v363_v58, 2  ;;  %vm364_vm3 = vcmp.lt.s32.totalorder %v363_v58, 2 }
  0xda   :  { %v212_v30 = vsel %vm210_vm11, %v197_v25, %v211_v28  ;;  %v341_v33 = vsel %vm220_vm14, %v340_v13, %v339_v27 }
  0xdb   :  { %v216_v14 = vsel %vm209_vm10, %v212_v30, %v215_v31  ;;  %v344_v39 = vsel %vm628_vm0, %v494_v34, %v341_v33 }
  0xdc   :  { %v217_v36 = vsel %vm206_vm15, nan, %v216_v14  ;;  %v346_v41 = vmul.f32 %v344_v39, %v344_v39 }
  0xdd   :  { %374 = vst.msk [vmem:[#allocation2] sm:$0xff] %vm373_vm13, %v217_v36 }
  0xde   :  { %v354_v43 = vmul.f32 -0.00019511016, %v346_v41  ;;  %v347_v18 = vmul.f32 -0.001358992, %v346_v41 }
  0xe0   :  { %v355_v44 = vadd.f32 0.008332121, %v354_v43  ;;  %v348_v37 = vadd.f32 0.041655596, %v347_v18 }
  0xe2   :  { %v356_v40 = vmul.f32 %v355_v44, %v346_v41  ;;  %v349_v1 = vmul.f32 %v348_v37, %v346_v41 }
  0xe4   :  { %v357_v47 = vadd.f32 -0.16666654, %v356_v40  ;;  %v350_v52 = vadd.f32 -0.4999988, %v349_v1 }
  0xe6   :  { %v358_v29 = vmul.f32 %v357_v47, %v346_v41  ;;  %v351_v54 = vmul.f32 %v350_v52, %v346_v41 }
  0xe8   :  { %v359_v55 = vadd.f32 1.0, %v358_v29  ;;  %v352_v57 = vadd.f32 1.0, %v351_v54 }
  0xea   :  { %v360_v42 = vmul.f32 %v359_v55, %v344_v39  ;;  %v369_v61 = vxor.u32 2147483648, %v352_v57 }
  0xec   :  { %v366_v46 = vxor.u32 2147483648, %v360_v42  ;;  %v370_v0 = vsel %vm368_vm2, %v369_v61, %v360_v42 }
  0xee   :  { %v367_v63 = vsel %vm365_vm1, %v352_v57, %v366_v46 }
  0xef   :  { %v371_v3 = vsel %vm364_vm3, %v367_v63, %v370_v0 }
  0xf0   :  { %v372_v4 = vsel %vm361_vm4, nan, %v371_v3 }
  0xf1   :  { %375 = vst.msk [vmem:[#allocation2 + $0x8] sm:$0xff] %vm373_vm13, %v372_v4 }
  0xf2   :  { %388 = dma.vmem_to_hbm [thread:$0]  %s381_s1, 256, %s383_s21, [#allocation3], %s453_s22, %s453_s22, %s454_s23  }
  0xf3   :  { %441 = dma.done.wait [#allocation3], 256  }
  0xf4   :  { %442 = vsyncadd [#allocation3], 4294967040 }
  0xf5   :  { %393 = vsyncpa [#allocation3], 1 }

</bundles_post_ra>
